<compile_context>
chip_gen: v6e
topology: v6e:2x2x1
jax: 0.10.0
libtpu: 0.0.40
codegen_flags: <defaults>
</compile_context>

<pallas_src>
import jax
import jax.numpy as jnp
from jax.experimental import pallas as pl
from jax.experimental.pallas import tpu as pltpu


def highway_kernel(x_ref, wp_ref, bp_ref, wg_ref, bg_ref, o_ref):
    # x_ref: (tm, Ep), wp/wg: (Ep, Ep), bp/bg: (1, Ep), o_ref: (tm, Ep)
    x = x_ref[...].astype(jnp.float32)

    # projection branch: Linear -> ReLU   (MXU matmul + VPU max)
    proj_pre = jnp.dot(x, wp_ref[...], preferred_element_type=jnp.float32) + bp_ref[...]
    x_proj = jnp.maximum(proj_pre, 0.0)

    # gate branch (from x_proj, matching the reference module): Linear -> sigmoid
    gate_pre = jnp.dot(x_proj, wg_ref[...], preferred_element_type=jnp.float32) + bg_ref[...]
    # sigmoid(z) = 1 / (1 + exp(-z)); exp and approx reciprocal both land on the EUP slot.
    x_gate = pl.reciprocal(1.0 + jnp.exp(-gate_pre), approx=True)

    # highway mix (f32, then downcast to the output dtype)
    out = x_gate * x_proj + (1.0 - x_gate) * x
    o_ref[...] = out.astype(o_ref.dtype)


def _round_up(v, m):
    return ((v + m - 1) // m) * m


def highway_pallas(x, w_proj, b_proj, w_gate, b_gate, *, tm_max=512):
    """x: [N, E]; w_*: PyTorch-style [out, in]; b_*: [E].  Returns [N, E] in x.dtype."""
    N, E = x.shape
    LANE, SUBLANE = 128, 8

    # Lane-dense padded feature dim (unmasked full-lane stores) and padded row count.
    Ep = _round_up(E, LANE)
    tm = min(_round_up(tm_max, SUBLANE), _round_up(N, SUBLANE))
    Np = _round_up(N, tm)
    grid = (Np // tm,)

    # ---- wrapper-side glue (plain JAX): transpose + zero-pad params and input ----
    # Weights pre-transposed to [E_in, E_out] so the kernel does x @ W + b.
    wp_t = jnp.zeros((Ep, Ep), jnp.float32).at[:E, :E].set(jnp.asarray(w_proj, jnp.float32).T)
    wg_t = jnp.zeros((Ep, Ep), jnp.float32).at[:E, :E].set(jnp.asarray(w_gate, jnp.float32).T)
    bp = jnp.zeros((1, Ep), jnp.float32).at[0, :E].set(jnp.asarray(b_proj, jnp.float32))
    bg = jnp.zeros((1, Ep), jnp.float32).at[0, :E].set(jnp.asarray(b_gate, jnp.float32))
    x_pad = jnp.zeros((Np, Ep), x.dtype).at[:N, :E].set(x)

    itemsize = jnp.dtype(x.dtype).itemsize
    cost = pl.CostEstimate(
        flops=2 * 2 * Np * Ep * Ep,                       # two (tm,Ep)x(Ep,Ep) matmuls per row
        transcendentals=Np * Ep,                          # exp for the sigmoid
        bytes_accessed=2 * Np * Ep * itemsize + 2 * Ep * Ep * 4 + 2 * Ep * 4,
    )

    out_pad = pl.pallas_call(
        highway_kernel,
        out_shape=jax.ShapeDtypeStruct((Np, Ep), x.dtype),
        grid_spec=pltpu.PrefetchScalarGridSpec(
            num_scalar_prefetch=0,
            grid=grid,
            in_specs=[
                pl.BlockSpec((tm, Ep), lambda i: (i, 0)),   # x tile (streamed)
                pl.BlockSpec((Ep, Ep), lambda i: (0, 0)),   # W_proj^T (resident)
                pl.BlockSpec((1, Ep), lambda i: (0, 0)),    # b_proj  (resident)
                pl.BlockSpec((Ep, Ep), lambda i: (0, 0)),   # W_gate^T (resident)
                pl.BlockSpec((1, Ep), lambda i: (0, 0)),    # b_gate  (resident)
            ],
            out_specs=pl.BlockSpec((tm, Ep), lambda i: (i, 0)),
        ),
        compiler_params=pltpu.CompilerParams(
            dimension_semantics=("parallel",),              # megacore-shardable on v7x
        ),
        cost_estimate=cost,
    )(x_pad, wp_t, bp, wg_t, bg)

    return out_pad[:N, :E]


def highway_ref(x, w_proj, b_proj, w_gate, b_gate):
    x32 = x.astype(jnp.float32)
    proj = jnp.maximum(x32 @ w_proj.T + b_proj, 0.0)
    gate = jax.nn.sigmoid(proj @ w_gate.T + b_gate)
    return (gate * proj + (1.0 - gate) * x32).astype(x.dtype)


if __name__ == "__main__":
    eword_size = 64   # E
    batch = 50        # N (deliberately NOT a multiple of the tile to exercise tail padding)

    key = jax.random.PRNGKey(0)
    kx, kwp, kbp, kwg, kbg = jax.random.split(key, 5)

    # Deterministic parameter init (PyTorch Linear-style uniform +/- 1/sqrt(in)).
    bound = 1.0 / jnp.sqrt(jnp.float32(eword_size))
    w_proj = jax.random.uniform(kwp, (eword_size, eword_size), jnp.float32, -bound, bound)
    b_proj = jax.random.uniform(kbp, (eword_size,), jnp.float32, -bound, bound)
    w_gate = jax.random.uniform(kwg, (eword_size, eword_size), jnp.float32, -bound, bound)
    b_gate = jax.random.uniform(kbg, (eword_size,), jnp.float32, -bound, bound)

    x = jax.random.normal(kx, (batch, eword_size), jnp.float32)

    # Small tm_max so the demo exercises a multi-step grid + the row-tail path;
    # production default is tm_max=512.
    out = highway_pallas(x, w_proj, b_proj, w_gate, b_gate, tm_max=16)
    out = jax.block_until_ready(out)

    ref = highway_ref(x, w_proj, b_proj, w_gate, b_gate)
    assert out.shape == (batch, eword_size)
    # Tolerance accounts for the EUP approximate reciprocal used for the sigmoid.
    assert jnp.allclose(out, ref, atol=5e-3, rtol=5e-3), float(jnp.max(jnp.abs(out - ref)))

    print("KERNEL_OK")
</pallas_src>

<mosaic_0001>
module attributes {stable_mosaic.version = 11 : i64} {
  func.func @highway_kernel(%arg0: i32, %arg1: memref<16x128xf32, #tpu.memory_space<vmem>>, %arg2: memref<128x128xf32, #tpu.memory_space<vmem>>, %arg3: memref<1x128xf32, #tpu.memory_space<vmem>>, %arg4: memref<128x128xf32, #tpu.memory_space<vmem>>, %arg5: memref<1x128xf32, #tpu.memory_space<vmem>>, %arg6: memref<16x128xf32, #tpu.memory_space<vmem>>) attributes {dimension_semantics = [#tpu.dimension_semantics<parallel>], iteration_bounds = array<i64: 4>, scalar_prefetch = 0 : i64, scratch_operands = 0 : i64, tpu.core_type = #tpu.core_type<tc>, window_params = [{transform_indices = @transform_0, window_bounds = array<i64: 16, 128>}, {pipeline_mode = #tpu.pipeline_mode<synchronous>, transform_indices = @transform_1, window_bounds = array<i64: 128, 128>}, {pipeline_mode = #tpu.pipeline_mode<synchronous>, transform_indices = @transform_2, window_bounds = array<i64: 1, 128>}, {pipeline_mode = #tpu.pipeline_mode<synchronous>, transform_indices = @transform_3, window_bounds = array<i64: 128, 128>}, {pipeline_mode = #tpu.pipeline_mode<synchronous>, transform_indices = @transform_4, window_bounds = array<i64: 1, 128>}, {transform_indices = @transform_5, window_bounds = array<i64: 16, 128>}]} {
    %c0 = arith.constant 0 : index
    %c0_0 = arith.constant 0 : index
    %0 = vector.load %arg1[%c0, %c0_0] : memref<16x128xf32, #tpu.memory_space<vmem>>, vector<16x128xf32>
    %c0_1 = arith.constant 0 : index
    %c0_2 = arith.constant 0 : index
    %1 = vector.load %arg2[%c0_1, %c0_2] : memref<128x128xf32, #tpu.memory_space<vmem>>, vector<128x128xf32>
    %cst = arith.constant dense<0.000000e+00> : vector<16x128xf32>
    %2 = tpu.matmul %0, %1, %cst {dimension_numbers = #tpu.dot_dimension_numbers<[1], [0], [0], [1], [0, 0, 1, 1], [], []>} : vector<16x128xf32>, vector<128x128xf32>, vector<16x128xf32> -> vector<16x128xf32>
    %c0_3 = arith.constant 0 : index
    %c0_4 = arith.constant 0 : index
    %3 = vector.load %arg3[%c0_3, %c0_4] : memref<1x128xf32, #tpu.memory_space<vmem>>, vector<1x128xf32>
    %4 = vector.broadcast %3 : vector<1x128xf32> to vector<16x128xf32>
    %5 = arith.addf %2, %4 : vector<16x128xf32>
    %cst_5 = arith.constant 0.000000e+00 : f32
    %6 = vector.broadcast %cst_5 : f32 to vector<16x128xf32>
    %7 = arith.maximumf %5, %6 : vector<16x128xf32>
    %c0_6 = arith.constant 0 : index
    %c0_7 = arith.constant 0 : index
    %8 = vector.load %arg4[%c0_6, %c0_7] : memref<128x128xf32, #tpu.memory_space<vmem>>, vector<128x128xf32>
    %cst_8 = arith.constant dense<0.000000e+00> : vector<16x128xf32>
    %9 = tpu.matmul %7, %8, %cst_8 {dimension_numbers = #tpu.dot_dimension_numbers<[1], [0], [0], [1], [0, 0, 1, 1], [], []>} : vector<16x128xf32>, vector<128x128xf32>, vector<16x128xf32> -> vector<16x128xf32>
    %c0_9 = arith.constant 0 : index
    %c0_10 = arith.constant 0 : index
    %10 = vector.load %arg5[%c0_9, %c0_10] : memref<1x128xf32, #tpu.memory_space<vmem>>, vector<1x128xf32>
    %11 = vector.broadcast %10 : vector<1x128xf32> to vector<16x128xf32>
    %12 = arith.addf %9, %11 : vector<16x128xf32>
    %cst_11 = arith.constant 0.000000e+00 : f32
    %13 = vector.broadcast %cst_11 : f32 to vector<16x128xf32>
    %14 = arith.subf %13, %12 : vector<16x128xf32>
    %15 = math.exp %14 : vector<16x128xf32>
    %cst_12 = arith.constant 1.000000e+00 : f32
    %16 = vector.broadcast %cst_12 : f32 to vector<16x128xf32>
    %17 = arith.addf %16, %15 : vector<16x128xf32>
    %18 = tpu.reciprocal %17 {approx = true} : vector<16x128xf32> -> vector<16x128xf32>
    %19 = arith.mulf %18, %7 : vector<16x128xf32>
    %cst_13 = arith.constant 1.000000e+00 : f32
    %20 = vector.broadcast %cst_13 : f32 to vector<16x128xf32>
    %21 = arith.subf %20, %18 : vector<16x128xf32>
    %22 = arith.mulf %21, %0 : vector<16x128xf32>
    %23 = arith.addf %19, %22 : vector<16x128xf32>
    %c0_14 = arith.constant 0 : index
    %c0_15 = arith.constant 0 : index
    %24 = vector.load %arg6[%c0_14, %c0_15] : memref<16x128xf32, #tpu.memory_space<vmem>>, vector<16x128xf32>
    tpu.vector_store %arg6[%c0_14, %c0_15], %23 {strides = array<i32>} : memref<16x128xf32, #tpu.memory_space<vmem>>, vector<16x128xf32>,
    return
  }
  func.func @transform_0(%arg0: i32) -> (i32, i32) {
    %c0_i32 = arith.constant 0 : i32
    %c0_i32_0 = arith.constant 0 : i32
    return %arg0, %c0_i32 : i32, i32
  }
  func.func @transform_1(%arg0: i32) -> (i32, i32) {
    %c0_i32 = arith.constant 0 : i32
    %c0_i32_0 = arith.constant 0 : i32
    %c0_i32_1 = arith.constant 0 : i32
    return %c0_i32, %c0_i32_0 : i32, i32
  }
  func.func @transform_2(%arg0: i32) -> (i32, i32) {
    %c0_i32 = arith.constant 0 : i32
    %c0_i32_0 = arith.constant 0 : i32
    %c0_i32_1 = arith.constant 0 : i32
    return %c0_i32, %c0_i32_0 : i32, i32
  }
  func.func @transform_3(%arg0: i32) -> (i32, i32) {
    %c0_i32 = arith.constant 0 : i32
    %c0_i32_0 = arith.constant 0 : i32
    %c0_i32_1 = arith.constant 0 : i32
    return %c0_i32, %c0_i32_0 : i32, i32
  }
  func.func @transform_4(%arg0: i32) -> (i32, i32) {
    %c0_i32 = arith.constant 0 : i32
    %c0_i32_0 = arith.constant 0 : i32
    %c0_i32_1 = arith.constant 0 : i32
    return %c0_i32, %c0_i32_0 : i32, i32
  }
  func.func @transform_5(%arg0: i32) -> (i32, i32) {
    %c0_i32 = arith.constant 0 : i32
    %c0_i32_0 = arith.constant 0 : i32
    return %arg0, %c0_i32 : i32, i32
  }
}

</mosaic_0001>

<bundles_post_ra>
// kernel: tpu_custom_call.1
= control target key start
LH: loop header
LB: loop body
LE: loop exit
PB: predicated region body
PF: predicated region fallthrough
CT: control target
= control target key end

     0   :  { %10 = vsyncpa [#allocation3], 0  ;;  %s1208_s0 = inlined_call_operand.hbm [shape: f32[64,128], index: 0, kind: input, shape index: {}]   ;;  %s1209_s1 = inlined_call_operand.hbm [shape: f32[128,128], index: 1, kind: input, shape index: {}]   ;;  %s1210_s2 = inlined_call_operand.vmem [shape: f32[1,128], index: 2, kind: input, shape index: {}]   ;;  %s1211_s3 = inlined_call_operand.hbm [shape: f32[128,128], index: 3, kind: input, shape index: {}]   ;;  %s1212_s4 = inlined_call_operand.vmem [shape: f32[1,128], index: 4, kind: input, shape index: {}]   ;;  %s1213_s5 = inlined_call_operand.hbm [shape: f32[64,128], index: 5, kind: output, shape index: {}]  }
   0x1   :  { %12 = vsyncpa [#allocation3 + $0x1], 0 }
   0x2   :  { %13 = vsyncpa [#allocation6], 0 }
   0x3   :  { %14 = vsyncpa [#allocation4], 0 }
   0x4   :  { %16 = vsyncpa [#allocation4 + $0x1], 0  ;;  %s995_s18 = smov 0   ;;  %s997_s19 = smov 0  }
   0x5   :  { %s999_s20 = smov 0   ;;  %s1001_s21 = smov 0  }
   0x6 LB: > { %s1016_s22 = sadd.s32 4294967295, %s955_s21   ;;  %s600_s23 = sadd.s32 4294967294, %s955_s21   ;;  %s955_s21 = sphi %s1001_s21, %s1235_s21   ;;  %s951_s20 = sphi %s999_s20, %s1234_s20   ;;  %s947_s19 = sphi %s997_s19, %s1233_s19   ;;  %s943_s18 = sphi %s995_s18, %s1232_s18  }
   0x7   : > { %p42_p0 = scmp.ne.s32.totalorder %s947_s19, %s943_s18  ;;  %p1214_p1 = scmp.eq.s32.totalorder %s1016_s22, 0 }
   0x8   : > { %p150_p2 = scmp.eq.s32.totalorder %s1016_s22, 3  ;;  %p156_p3 = scmp.eq.s32.totalorder %s600_s23, 3 }
   0x9   : > { %p1025_p4 = por %p1214_p1, %p42_p0  ;;  %p601_p5 = scmp.ge.s32.totalorder %s955_s21, 1 }
   0xa   : > { %p1030_p6 = por %p156_p3, %p42_p0  ;;  %p163_p7 = scmp.lt.s32.totalorder %s955_s21, 5 }
   0xb   : > { %s1219_s24 = scalar_select %p1025_p4, 1, 0 }
   0xc   : > { %s1220_s25 = scalar_select %p1030_p6, 1, 0 }
   0xd   : > { %p1035_p8 = pnand %p601_p5, %p163_p7  ;;  %s957_s27 = smov [#allocation5]  }
   0xe   : > { %s175_s28 = sshll.u32 %s957_s27, 4  ;;  %s958_s30 = smov [#allocation7]   ;;  %s176_s28 = int_to_ptr.vmem [resolvable:$true] %s175_s28 }
   0xf   : > { %s1221_s26 = scalar_select %p1035_p8, 1, 0 }
  0x10   : > { %p740_p9 = pneg %p1035_p8  ;;  %s191_s6 = sshll.u32 %s958_s30, 4  ;;  %s192_s6 = int_to_ptr.vmem [resolvable:$true] %s191_s6 }
  0x11   : > { %s818_s7 = scalar_lea.vmem %s176_s28, 2048  ;;  %p826_p3 = scmp.lt.s32.totalorder %s176_s28, %s176_s28 }
  0x12   : > { %p1043_p10 = pnand %p740_p9, %p1214_p1  ;;  %p819_p12 = scmp.ne.s32.totalorder %s176_s28, %s818_s7 }
  0x13   : > { %p827_p5 = scmp.lt.s32.totalorder %s818_s7, %s818_s7 }
  0x14   : > { %p809_p11 = pneg %p1043_p10 }
  0x15   : > { %p828_p7 = por %p827_p5, %p826_p3 }
  0x16   : > { %p821_p13 = pnand %p819_p12, %p809_p11 }
  0x18   : > { %p822_p0 = pneg %p821_p13 }
  0x1a   : > { %p829_p9 = pnand %p828_p7, %p822_p0 }
  0x1c   : > { %832 = shalt.err (!%p829_p9)
}
  0x1d   : > { %s1215_s8 = smov 128   ;;  %s960_s9 = smov 8  }
  0x1e   : > { %743 = dma.hbm_to_vmem [thread:$0]  (!%p1043_p10), %s1209_s1, 2048, %s176_s28, [#allocation6], %s1215_s8, %s1215_s8, %s960_s9  }
  0x1f   : > { %s844_s12 = scalar_lea.vmem %s192_s6, 2048  ;;  %p852_p0 = scmp.lt.s32.totalorder %s192_s6, %s192_s6 }
  0x20   : > { %p845_p12 = scmp.ne.s32.totalorder %s192_s6, %s844_s12  ;;  %p853_p5 = scmp.lt.s32.totalorder %s844_s12, %s844_s12 }
  0x22   : > { %p847_p13 = pnand %p845_p12, %p809_p11  ;;  %p854_p7 = por %p853_p5, %p852_p0 }
  0x24   : > { %p848_p3 = pneg %p847_p13 }
  0x26   : > { %p855_p9 = pnand %p854_p7, %p848_p3 }
  0x28   : > { %858 = shalt.err (!%p855_p9)
}
  0x29   : > { %746 = dma.hbm_to_vmem [thread:$0]  (!%p1043_p10), %s1211_s3, 2048, %s192_s6, [#allocation6], %s1215_s8, %s1215_s8, %s960_s9  }
  0x2a   : > { %s1072_s15 = sadd.s32 1, %s955_s21   ;;  %s29_s16 = sadd.s32 1, %s951_s20 }
  0x2b   : > { %s26_s17 = ssub.s32 %s955_s21, %s1072_s15  ;;  %p36_p11 = scmp.ne.s32.totalorder %s951_s20, %s947_s19 }
  0x2c   : > { %p27_p12 = scmp.eq.s32.totalorder %s26_s17, 0  ;;  %p37_p13 = scmp.eq.s32.totalorder %s955_s21, 0 }
  0x2d   : > { %p1082_p3 = por %p150_p2, %p36_p11  ;;  %p757_p0 = scmp.lt.s32.totalorder %s955_s21, 4 }
  0x2e   : > { %s1088_s27 = scalar_select %p27_p12, %s951_s20, %s29_s16  }
  0x2f   : > { %s1223_s23 = scalar_select %p1082_p3, 1, 0 }
  0x30   : > { %p38_p5 = por %p37_p13, %p36_p11  ;;  %s208_s28 = sand.u32 1, %s951_s20  }
  0x31   : > { %s605_s29 = sshll.u32 %s208_s28, 4  ;;  %s620_s30 = sshll.u32 %s955_s21, 8 }
  0x32   : > { %s1095_s10 = scalar_lea.hbm %s1208_s0, %s620_s30  ;;  %s212_s11 = scalar_lea.vmem [#allocation2], %s605_s29 }
  0x33   : > { %s219_s12 = sshll.u32 %s212_s11, 4  ;;  %p1099_p2 = pnand %p757_p0, %p38_p5  ;;  %s1097_s12 = int_to_ptr.vmem [resolvable:$true] %s219_s12 }
  0x34   : > { %s1103_s14 = scalar_lea.sflag [#allocation3], %s208_s28  ;;  %s859_s16 = scalar_lea.hbm %s1095_s10, 256 }
  0x35   : > { %p860_p10 = scmp.ne.s32.totalorder %s1095_s10, %s859_s16  ;;  %p861_p7 = pneg %p1099_p2 }
  0x36   : > { %s864_s29 = scalar_lea.hbm %s1208_s0, 1024  ;;  %p865_p12 = scmp.lt.s32.totalorder %s1095_s10, %s1208_s0 }
  0x37   : > { %p862_p9 = pnand %p861_p7, %p860_p10  ;;  %p866_p13 = scmp.lt.s32.totalorder %s864_s29, %s859_s16 }
  0x39   : > { %p863_p11 = pneg %p862_p9  ;;  %p867_p0 = por %p866_p13, %p865_p12 }
  0x3b   : > { %p868_p5 = pnand %p867_p0, %p863_p11 }
  0x3d   : > { %871 = shalt.err (!%p868_p5)
}
  0x3e   : > { %s872_s28 = scalar_lea.vmem %s1097_s12, 256  ;;  %s961_s11 = smov [#allocation2]  }
  0x3f   : > { %p873_p1 = scmp.ne.s32.totalorder %s1097_s12, %s872_s28  ;;  %s877_s8 = sshll.u32 %s961_s11, 4  ;;  %s878_s8 = int_to_ptr.vmem [resolvable:$false] %s877_s8 }
  0x40   : > { %s879_s17 = scalar_lea.vmem %s878_s8, 512  ;;  %p880_p9 = scmp.lt.s32.totalorder %s1097_s12, %s878_s8 }
  0x41   : > { %p875_p6 = pnand %p873_p1, %p861_p7  ;;  %p881_p3 = scmp.lt.s32.totalorder %s879_s17, %s872_s28 }
  0x43   : > { %p876_p10 = pneg %p875_p6  ;;  %p882_p4 = por %p881_p3, %p880_p9 }
  0x45   : > { %p883_p8 = pnand %p882_p4, %p876_p10 }
  0x47   : > { %886 = shalt.err (!%p883_p8)
}
  0x48   : > { %s1225_s16 = smov 128   ;;  %p1226_p1 = scmp.ne.s32.totalorder %s1221_s26, 0 }
  0x49   : > { %750 = dma.hbm_to_vmem [thread:$0]  (!%p1099_p2), %s1095_s10, 256, %s1097_s12, %s1103_s14, %s1225_s16, %s1225_s16, %s960_s9  }
  0x4a   : > { %231 = sbr.rel (%p1226_p1) target bundleno = 567 (0x237), region = 40  ;;  %s1130_s30 = sand.u32 (!%p1226_p1), 1, %s947_s19  }
  0x4b   : > { %s609_s8 = sshll.u32 (!%p1226_p1), %s1130_s30, 4  ;;  %s234_s29 = scalar_lea.sflag (!%p1226_p1), [#allocation3], %s1130_s30 }
  0x4c   : > { %s1136_s13 = scalar_lea.vmem (!%p1226_p1), [#allocation2], %s609_s8  ;;  %p1227_p4 = scmp.ne.s32.totalorder (!%p1226_p1), %s1219_s24, 0 }
  0x4f   : > { %930 = dma.done.wait (%p1227_p4), %s234_s29, 256  }
  0x50   : > { %932 = vsyncadd (%p1227_p4), %s234_s29, 4294967040  ;;  %p1228_p6 = scmp.eq.s32.totalorder %s1016_s22, 0 }
  0x52   : > { %934 = dma.done.wait (%p1228_p6), [#allocation6], 4096   ;;  %p1229_p8 = pmov %p1228_p6 }
  0x53   : > { %v291_v0 = vld [vmem:[#allocation5 + $0x78] sm:$0xff]  ;;  %v290_v1 = vld [vmem:[#allocation5 + $0x70] sm:$0xff]  ;;  %v289_v2 = vld [vmem:[#allocation5 + $0x68] sm:$0xff]  ;;  %s621_s12 = sshll.u32 %s1016_s22, 8  ;;  %s271_s14 = scalar_lea.vmem [#allocation8], %s609_s8 }
  0x54   : > { %936 = vsyncadd (%p1229_p8), [#allocation6], 4294963200  ;;  %658 = vmatprep.subr.mxu0 %v291_v0  ;;  %v288_v3 = vld [vmem:[#allocation5 + $0x60] sm:$0xff]  ;;  %v287_v5 = vld [vmem:[#allocation5 + $0x58] sm:$0xff]  ;;  %s508_s6 = sshll.u32 %s271_s14, 4  ;;  %s1164_s11 = scalar_lea.hbm %s1213_s5, %s621_s12  ;;  %s1166_s6 = int_to_ptr.vmem [resolvable:$true] %s508_s6 }
  0x55   : > { %659 = vmatpush3.msra.mxu0 %v291_v0  ;;  %v1147_v4 = vld [vmem:[%s1136_s13] sm:$0xff]  ;;  %v391_v6 = vld [vmem:[#allocation7 + $0x78] sm:$0xff]  ;;  %v389_v9 = vld [vmem:[#allocation7 + $0x68] sm:$0xff]  ;;  %s495_s22 = scalar_lea.sflag [#allocation4], %s1130_s30  ;;  %s887_s17 = scalar_lea.vmem %s1166_s6, 256 }
  0x56   : > { %660 = vmatprep.subr.mxu0 %v290_v1  ;;  %690 = vmatprep.mubr.f32.mxu0 %v1147_v4  ;;  %v390_v7 = vld [vmem:[#allocation7 + $0x70] sm:$0xff]  ;;  %v285_v10 = vld [vmem:[#allocation5 + $0x48] sm:$0xff]  ;;  %v388_v11 = vld [vmem:[#allocation7 + $0x60] sm:$0xff]  ;;  %p888_p3 = scmp.ne.s32.totalorder %s1166_s6, %s887_s17  ;;  %p1230_p2 = scmp.ne.s32.totalorder %s1223_s23, 0 }
  0x57   : > { %661 = vmatpush3.msra.mxu0 %v290_v1  ;;  %693 = vmatprep.subr.mxu1 %v391_v6  ;;  %v286_v8 = vld [vmem:[#allocation5 + $0x50] sm:$0xff]  ;;  %v284_v12 = vld [vmem:[#allocation5 + $0x40] sm:$0xff]  ;;  %v387_v13 = vld [vmem:[#allocation7 + $0x58] sm:$0xff]  ;;  %s962_s16 = smov [#allocation8]  }
  0x58   : > { %662 = vmatprep.subr.mxu0 %v289_v2  ;;  %694 = vmatpush3.msra.mxu1 %v391_v6  ;;  %v283_v14 = vld [vmem:[#allocation5 + $0x38] sm:$0xff]  ;;  %v386_v15 = vld [vmem:[#allocation7 + $0x50] sm:$0xff]  ;;  %v385_v17 = vld [vmem:[#allocation7 + $0x48] sm:$0xff]  ;;  %p889_p7 = pnand %p888_p3, %p1230_p2  ;;  %s891_s8 = sshll.u32 %s962_s16, 4  ;;  %s892_s8 = int_to_ptr.vmem [resolvable:$false] %s891_s8 }
  0x59   : > { %663 = vmatpush3.msra.mxu0 %v289_v2  ;;  %695 = vmatprep.subr.mxu1 %v390_v7  ;;  %v282_v16 = vld [vmem:[#allocation5 + $0x30] sm:$0xff]  ;;  %v281_v18 = vld [vmem:[#allocation5 + $0x28] sm:$0xff]  ;;  %v384_v19 = vld [vmem:[#allocation7 + $0x40] sm:$0xff]  ;;  %s893_s29 = scalar_lea.vmem %s892_s8, 512  ;;  %p894_p12 = scmp.lt.s32.totalorder %s1166_s6, %s892_s8 }
  0x5a   : > { %664 = vmatprep.subr.mxu0 %v288_v3  ;;  %696 = vmatpush3.msra.mxu1 %v390_v7  ;;  %v280_v20 = vld [vmem:[#allocation5 + $0x20] sm:$0xff]  ;;  %v383_v21 = vld [vmem:[#allocation7 + $0x38] sm:$0xff]  ;;  %v382_v23 = vld [vmem:[#allocation7 + $0x30] sm:$0xff]  ;;  %p890_p11 = pneg %p889_p7  ;;  %p895_p13 = scmp.lt.s32.totalorder %s893_s29, %s887_s17 }
  0x5b   : > { %665 = vmatpush3.msra.mxu0 %v288_v3  ;;  %697 = vmatprep.subr.mxu1 %v389_v9  ;;  %v279_v22 = vld [vmem:[#allocation5 + $0x18] sm:$0xff]  ;;  %v278_v24 = vld [vmem:[#allocation5 + $0x10] sm:$0xff]  ;;  %v381_v25 = vld [vmem:[#allocation7 + $0x28] sm:$0xff] }
  0x5c   : > { %666 = vmatprep.subr.mxu0 %v287_v5  ;;  %698 = vmatpush3.msra.mxu1 %v389_v9  ;;  %v277_v26 = vld [vmem:[#allocation5 + $0x8] sm:$0xff]  ;;  %v380_v27 = vld [vmem:[#allocation7 + $0x20] sm:$0xff]  ;;  %v379_v30 = vld [vmem:[#allocation7 + $0x18] sm:$0xff]  ;;  %p896_p0 = por %p895_p13, %p894_p12 }
  0x5d   : > { %667 = vmatpush3.msra.mxu0 %v287_v5  ;;  %699 = vmatprep.subr.mxu1 %v388_v11  ;;  %v276_v28 = vld [vmem:[#allocation5] sm:$0xff]  ;;  %v275_v29 = vld [vmem:[%s1136_s13 + $0x8] sm:$0xff]  ;;  %v378_v31 = vld [vmem:[#allocation7 + $0x10] sm:$0xff] }
  0x5e   : > { %668 = vmatprep.subr.mxu0 %v286_v8  ;;  %700 = vmatpush3.msra.mxu1 %v388_v11  ;;  %v377_v32 = vld [vmem:[#allocation7 + $0x8] sm:$0xff]  ;;  %v376_v33 = vld [vmem:[#allocation7] sm:$0xff]  ;;  %p897_p5 = pnand %p896_p0, %p890_p11 }
  0x5f   : > { %669 = vmatpush3.msra.mxu0 %v286_v8  ;;  %701 = vmatprep.subr.mxu1 %v387_v13  ;;  %v613_v34 = vld [vmem:[%s1210_s2] ss:$0 sm:$0xff] }
  0x60   : > { %670 = vmatprep.subr.mxu0 %v285_v10  ;;  %702 = vmatpush3.msra.mxu1 %v387_v13  ;;  %v614_v41 = vld [vmem:[%s1212_s4] ss:$0 sm:$0xff] }
  0x61   : > { %671 = vmatpush3.msra.mxu0 %v285_v10  ;;  %703 = vmatprep.subr.mxu1 %v386_v15 }
  0x62   : > { %672 = vmatprep.subr.mxu0 %v284_v12  ;;  %704 = vmatpush3.msra.mxu1 %v386_v15 }
  0x63   : > { %673 = vmatpush3.msra.mxu0 %v284_v12  ;;  %705 = vmatprep.subr.mxu1 %v385_v17 }
  0x64   : > { %674 = vmatprep.subr.mxu0 %v283_v14  ;;  %706 = vmatpush3.msra.mxu1 %v385_v17 }
  0x65   : > { %675 = vmatpush3.msra.mxu0 %v283_v14  ;;  %707 = vmatprep.subr.mxu1 %v384_v19 }
  0x66   : > { %676 = vmatprep.subr.mxu0 %v282_v16  ;;  %708 = vmatpush3.msra.mxu1 %v384_v19 }
  0x67   : > { %677 = vmatpush3.msra.mxu0 %v282_v16  ;;  %709 = vmatprep.subr.mxu1 %v383_v21 }
  0x68   : > { %678 = vmatprep.subr.mxu0 %v281_v18  ;;  %710 = vmatpush3.msra.mxu1 %v383_v21 }
  0x69   : > { %679 = vmatpush3.msra.mxu0 %v281_v18  ;;  %711 = vmatprep.subr.mxu1 %v382_v23 }
  0x6a   : > { %680 = vmatprep.subr.mxu0 %v280_v20  ;;  %712 = vmatpush3.msra.mxu1 %v382_v23 }
  0x6b   : > { %681 = vmatpush3.msra.mxu0 %v280_v20  ;;  %713 = vmatprep.subr.mxu1 %v381_v25 }
  0x6c   : > { %682 = vmatprep.subr.mxu0 %v279_v22  ;;  %714 = vmatpush3.msra.mxu1 %v381_v25 }
  0x6d   : > { %683 = vmatpush3.msra.mxu0 %v279_v22  ;;  %715 = vmatprep.subr.mxu1 %v380_v27 }
  0x6e   : > { %684 = vmatprep.subr.mxu0 %v278_v24  ;;  %716 = vmatpush3.msra.mxu1 %v380_v27 }
  0x6f   : > { %685 = vmatpush3.msra.mxu0 %v278_v24  ;;  %717 = vmatprep.subr.mxu1 %v379_v30 }
  0x70   : > { %686 = vmatprep.subr.mxu0 %v277_v26  ;;  %718 = vmatpush3.msra.mxu1 %v379_v30 }
  0x71   : > { %687 = vmatpush3.msra.mxu0 %v277_v26  ;;  %719 = vmatprep.subr.mxu1 %v378_v31 }
  0x72   : > { %688 = vmatprep.subr.mxu0 %v276_v28  ;;  %720 = vmatpush3.msra.mxu1 %v378_v31 }
  0x73   : > { %689 = vmatpush3.msra.mxu0 %v276_v28  ;;  %721 = vmatprep.subr.mxu1 %v377_v32 }
  0x74   : > { %691 = vmatmul.mubr.f32.vlgmr.msra.gmra.mxu0 %v275_v29  ;;  %722 = vmatpush3.msra.mxu1 %v377_v32 }
  0x75   : > { %723 = vmatprep.subr.mxu1 %v376_v33 }
  0x76   : > { %724 = vmatpush3.msra.mxu1 %v376_v33 }
 0x134   : > { %v692_v35 = vpop.f32.mrf.mxu0 }
 0x135   : > { %v371_v36 = vadd.f32 %v692_v35, %v613_v34 }
 0x136   : > { %v365_v37 = vpop.f32.mrf.mxu0 }
 0x137   : > { %v366_v38 = vadd.f32 %v613_v34, %v365_v37  ;;  %v375_v40 = vmax.f32 %v371_v36, 0.0 }
 0x139   : > { %v374_v39 = vmax.f32 %v366_v38, 0.0 }
 0x13b   : > { %725 = vmatprep.mubr.f32.mxu1 %v374_v39 }
 0x13c   : > { %726 = vmatmul.mubr.f32.vlgmr.msra.gmra.mxu1 %v375_v40 }
 0x1fc   : > { %v727_v42 = vpop.f32.mrf.mxu1 }
 0x1fd   : > { %v471_v43 = vadd.f32 %v727_v42, %v614_v41 }
 0x1fe   : > { %v465_v44 = vpop.f32.mrf.mxu1 }
 0x1ff   : > { %v475_v45 = vsub.f32 0.0, %v471_v43  ;;  %v466_v46 = vadd.f32 %v614_v41, %v465_v44 }
 0x201   : > { %v478_v47 = vmul.f32 1.442695, %v475_v45  ;;  %v474_v48 = vsub.f32 0.0, %v466_v46 }
 0x203   : > { %799 = vpow2.f32 %v478_v47  ;;  %v476_v49 = vmul.f32 1.442695, %v474_v48 }
 0x205   : > { %801 = vpow2.f32 %v476_v49 }
 0x210   : > { %v800_v50 = vpop.eup %799 }
 0x211   : > { %v481_v51 = vadd.f32 1.0, %v800_v50 }
 0x212   : > { %v802_v52 = vpop.eup %801 }
 0x213   : > { %803 = vrcp.f32 %v481_v51  ;;  %v480_v53 = vadd.f32 1.0, %v802_v52 }
 0x215   : > { %805 = vrcp.f32 %v480_v53 }
 0x220   : > { %v804_v54 = vpop.eup %803 }
 0x221   : > { %v487_v55 = vsub.f32 1.0, %v804_v54  ;;  %v485_v57 = vmul.f32 %v804_v54, %v375_v40 }
 0x222   : > { %v806_v56 = vpop.eup %805 }
 0x223   : > { %v486_v58 = vsub.f32 1.0, %v806_v56  ;;  %v489_v59 = vmul.f32 %v487_v55, %v275_v29  ;;  %v484_v60 = vmul.f32 %v806_v56, %v374_v39 }
 0x225   : > { %v488_v61 = vmul.f32 %v486_v58, %v1147_v4  ;;  %v491_v62 = vadd.f32 %v489_v59, %v485_v57 }
 0x227   : > { %v490_v63 = vadd.f32 %v488_v61, %v484_v60  ;;  %493 = vst [vmem:[%s271_s14 + $0x8] sm:$0xff] %v491_v62 }
 0x229   : > { %492 = vst [vmem:[%s271_s14] sm:$0xff] %v490_v63 }
 0x22a   : > { %900 = shalt.err (!%p897_p5)
}
 0x22b   : > { %s901_s13 = scalar_lea.hbm %s1164_s11, 256  ;;  %s905_s9 = scalar_lea.hbm %s1213_s5, 1024 }
 0x22c   : > { %p902_p10 = scmp.ne.s32.totalorder %s1164_s11, %s901_s13  ;;  %p906_p4 = scmp.lt.s32.totalorder %s1164_s11, %s1213_s5 }
 0x22d   : > { %p907_p6 = scmp.lt.s32.totalorder %s905_s9, %s901_s13 }
 0x22e   : > { %p903_p9 = pnand %p902_p10, %p1230_p2 }
 0x22f   : > { %p908_p8 = por %p907_p6, %p906_p4 }
 0x230   : > { %p904_p1 = pneg %p903_p9 }
 0x232   : > { %p909_p3 = pnand %p908_p8, %p904_p1 }
 0x234   : > { %912 = shalt.err (!%p909_p3)
}
 0x235   : > { %s963_s14 = smov 128   ;;  %s964_s7 = smov 8  }
 0x236   : > { %738 = dma.vmem_to_hbm [thread:$0]  (%p1230_p2), %s1166_s6, 256, %s1164_s11, %s495_s22, %s963_s14, %s963_s14, %s964_s7  }
 0x237 PF: > { %p760_p7 = scmp.ge.s32.totalorder %s955_s21, 2  ;;  %s523_s28 = sand.u32 1, %s943_s18  }
 0x238   : > { %p1231_p11 = scmp.ne.s32.totalorder %s1220_s25, 0  ;;  %s524_s17 = scalar_lea.sflag [#allocation4], %s523_s28 }
 0x23a   : > { %p752_p12 = pnand %p760_p7, %p1231_p11 }
 0x23c   : > { %p753_p13 = pneg %p752_p12 }
 0x23e   : > { %938 = dma.done.wait (%p753_p13), %s524_s17, 256  }
 0x23f   : > { %940 = vsyncadd (%p753_p13), %s524_s17, 4294967040  ;;  %p19_p0 = scmp.ge.s32.totalorder %s1072_s15, 6   ;;  %s1232_s18 = smov %s947_s19 }
 0x240   : > { %s1233_s19 = smov %s951_s20  ;;  %s1234_s20 = smov %s1088_s27 }
 0x241   : > { %s1235_s21 = smov %s1072_s15  ;;  %21 = sbr.rel (!%p19_p0) target bundleno = 6 (0x6), region = 93 }
 0x246   :  { %529 = vsyncpa [#allocation3], 1 }
 0x247   :  { %531 = vsyncpa [#allocation3 + $0x1], 1 }
 0x248   :  { %532 = vsyncpa [#allocation6], 1 }
 0x249   :  { %533 = vsyncpa [#allocation4], 1 }
 0x24a   :  { %535 = vsyncpa [#allocation4 + $0x1], 1 }

</bundles_post_ra>
